<compile_context>
chip_gen: v7x
topology: tpu7x:2x2x1
jax: 0.10.0
libtpu: 0.0.40
codegen_flags: <defaults>
</compile_context>

<pallas_src>
import functools
import math

import jax
import jax.numpy as jnp
from jax.experimental import pallas as pl
from jax.experimental.pallas import tpu as pltpu

NUM_BASES = 8
LANES = 128

_VMEM_LIMIT_BYTES = 48 * 1024 * 1024      # explicit scoped-VMEM limit (safe on v5e/v6e/v7x)
_DEFAULT_VMEM_BUDGET = 28 * 1024 * 1024   # budget for pipelined blocks + scratch
_DEFAULT_MAX_TILE_ROWS = 4096
_DEFAULT_MAX_FOLD_BATCH = 8


# ----------------------------------------------------------------------------
# One-time setup (plain JAX glue): mirrors gen_flow_bases + buffer packing.
# ----------------------------------------------------------------------------
def gen_flow_bases(height: int, width: int, weights: jnp.ndarray) -> jnp.ndarray:
    """JAX port of the torch.jit.script gen_flow_bases. Returns (8, H, W, 2) f32."""
    w_translation, w_shear, w_scale, w_perspective = (
        weights[0], weights[1], weights[2], weights[3]
    )
    hom = jnp.tile(jnp.eye(3, dtype=jnp.float32)[None], (NUM_BASES, 1, 1))
    hom = hom.at[0, 0, 2].set(w_translation)
    hom = hom.at[1, 1, 2].set(w_translation)
    hom = hom.at[2, 0, 1].set(w_shear)
    hom = hom.at[3, 1, 0].set(w_shear)
    hom = hom.at[4, 0, 0].set(w_scale)
    hom = hom.at[5, 1, 1].set(w_scale)
    hom = hom.at[6, 2, 0].set(w_perspective)
    hom = hom.at[7, 2, 1].set(w_perspective)

    # Matches the torch code exactly (including the (width, height) meshgrid
    # produced by indexing='ij' before the reshape).
    xs = jnp.linspace(0.0, 1.0, width, dtype=jnp.float32)
    ys = jnp.linspace(0.0, 1.0, height, dtype=jnp.float32)
    gx, gy = jnp.meshgrid(xs, ys, indexing="ij")          # (W, H) each
    grid = jnp.stack([gx, gy], axis=-1).reshape(height * width, 2)

    homogenous_grid = jnp.concatenate(
        [grid, jnp.ones_like(grid[..., :1])], axis=-1
    ).reshape(1, height * width, 3, 1)

    vectors = jnp.matmul(hom.reshape(NUM_BASES, 1, 3, 3), homogenous_grid).squeeze(-1)
    flow_fields = vectors[..., :2] / vectors[..., 2:] - grid[None, ...]   # (8, HW, 2)
    flow_fields = flow_fields / jnp.max(jnp.abs(flow_fields))

    # TODO(synk): QR factorization has no Pallas equivalent; done once at setup in plain JAX.
    q, _ = jnp.linalg.qr(flow_fields.reshape(NUM_BASES, height * width * 2).T)
    return q.T.reshape(NUM_BASES, height, width, 2)


def pack_flow_bases(flow_bases: jnp.ndarray, bases_dtype=jnp.bfloat16) -> jnp.ndarray:
    """Pack fixed flow bases once into the kernel's lane-dense (8, rows, 128) layout.

    Hoisted out of the per-call path: the per-call wrapper consumes this array
    directly, so there is no per-call reshape / pad / dtype-cast of the bases.
    """
    flow_bases = jnp.asarray(flow_bases)
    if flow_bases.ndim == 5:            # module buffer layout (1, 8, H, W, 2)
        flow_bases = flow_bases[0]
    k, h, w, c = flow_bases.shape
    assert k == NUM_BASES and c == 2
    n = h * w * c
    rows = -(-n // LANES)
    flat = flow_bases.reshape(NUM_BASES, n).astype(jnp.float32)
    if rows * LANES != n:
        flat = jnp.pad(flat, ((0, 0), (0, rows * LANES - n)))
    return flat.reshape(NUM_BASES, rows, LANES).astype(bases_dtype)


# ----------------------------------------------------------------------------
# Kernels: out = coords + sum_k w[b,k] * bases[k]   (VPU broadcast-FMAs, no MXU)
# ----------------------------------------------------------------------------
def _folded_batch_kernel(w_ref, bases_ref, coords_ref, out_ref, *scratch,
                         batch, use_scratch):
    # w_ref      : SMEM (B, 8) f32     (scalar-prefetched basis weights)
    # bases_ref  : VMEM (8, TR, 128)   bf16 or f32
    # coords_ref : VMEM (B, TR, 128)   coords dtype
    # out_ref    : VMEM (B, TR, 128)   coords dtype
    # scratch[0] : VMEM (8, TR, 128)   f32 (only when use_scratch)
    if use_scratch:
        basesf_ref = scratch[0]
        for k in range(NUM_BASES):                 # upcast once per row tile
            basesf_ref[k] = bases_ref[k].astype(jnp.float32)
        read_base = lambda k: basesf_ref[k]
    else:
        read_base = lambda k: bases_ref[k].astype(jnp.float32)

    for b in range(batch):                          # unrolled batch loop
        acc = coords_ref[b].astype(jnp.float32)
        for k in range(NUM_BASES):                  # unrolled: 8 broadcast-FMAs
            acc = acc + w_ref[b, k] * read_base(k)
        out_ref[b] = acc.astype(out_ref.dtype)


def _batched_grid_kernel(w_ref, bases_ref, coords_ref, out_ref, *scratch,
                         use_scratch):
    # grid = (row_tiles, B) with batch innermost ("arbitrary"): the bases block
    # (index_map ignores b) and the scratch stay resident across batch steps.
    b = pl.program_id(1)
    if use_scratch:
        basesf_ref = scratch[0]

        @pl.when(b == 0)
        def _():                                    # upcast once per row tile
            for k in range(NUM_BASES):
                basesf_ref[k] = bases_ref[k].astype(jnp.float32)

        read_base = lambda k: basesf_ref[k]
    else:
        read_base = lambda k: bases_ref[k].astype(jnp.float32)

    acc = coords_ref[0].astype(jnp.float32)
    for k in range(NUM_BASES):
        acc = acc + w_ref[b, k] * read_base(k)
    out_ref[0] = acc.astype(out_ref.dtype)


# ----------------------------------------------------------------------------
# Tile sizing: biggest row tile that fits the VMEM budget (double-buffered I/O).
# ----------------------------------------------------------------------------
def _choose_tile_rows(rows, batch_block, coord_bytes, bases_bytes, use_scratch,
                      vmem_budget_bytes, max_tile_rows):
    per_row = 2 * NUM_BASES * LANES * bases_bytes            # bases (x2 buffers)
    per_row += 2 * 2 * batch_block * LANES * coord_bytes     # coords + out (x2 buffers)
    if use_scratch:
        per_row += NUM_BASES * LANES * 4                     # f32 upcast scratch
    tile = min(max_tile_rows, max(8, vmem_budget_bytes // per_row))
    tile = max(8, (tile // 8) * 8)                           # sublane multiple of 8
    if rows <= tile:
        return rows, 1                                       # single (full-extent) block
    return tile, math.ceil(rows / tile)                      # last block may be partial


# ----------------------------------------------------------------------------
# Per-call wrapper
# ----------------------------------------------------------------------------
@functools.partial(
    jax.jit,
    static_argnames=("max_fold_batch", "vmem_budget_bytes", "max_tile_rows"),
)
def homography_basis_transform(coordinates, packed_flow_bases, basis_weights, *,
                               max_fold_batch=_DEFAULT_MAX_FOLD_BATCH,
                               vmem_budget_bytes=_DEFAULT_VMEM_BUDGET,
                               max_tile_rows=_DEFAULT_MAX_TILE_ROWS):
    """coordinates: (B,H,W,2), packed_flow_bases: (8, rows, 128) from pack_flow_bases,
    basis_weights: (B,8) / (B,8,1,1,1). Returns coordinates + sum_k w[b,k]*bases[k]."""
    B, H, W, C = coordinates.shape
    if C != 2:
        raise ValueError("coordinates must have a trailing dim of 2")
    N = H * W * C
    rows = -(-N // LANES)
    n_row = rows * LANES
    if packed_flow_bases.shape != (NUM_BASES, rows, LANES):
        raise ValueError(
            f"packed_flow_bases has shape {packed_flow_bases.shape}, expected "
            f"{(NUM_BASES, rows, LANES)} for coordinates of shape {coordinates.shape}")

    coord_dtype = coordinates.dtype
    coord_bytes = jnp.dtype(coord_dtype).itemsize
    bases_bytes = jnp.dtype(packed_flow_bases.dtype).itemsize
    need_cast = jnp.dtype(packed_flow_bases.dtype) != jnp.dtype(jnp.float32)

    coords_2d = coordinates.reshape(B, N)
    if n_row != N:
        # TODO(synk): ragged N % 128 tails force one pad copy here; could be handled
        # in-kernel with masked stores, but N = 2*H*W is a multiple of 128 for typical
        # image sizes so this path is normally dead.
        coords_2d = jnp.pad(coords_2d, ((0, 0), (0, n_row - N)))
    coords_3d = coords_2d.reshape(B, rows, LANES)

    w = basis_weights.reshape(B, NUM_BASES).astype(jnp.float32)

    if B <= max_fold_batch:
        # Folded-batch path: 1-D grid over row tiles, bases streamed from HBM once.
        use_scratch = need_cast and B >= 2
        tile_rows, num_row_tiles = _choose_tile_rows(
            rows, B, coord_bytes, bases_bytes, use_scratch,
            vmem_budget_bytes, max_tile_rows)
        scratch_shapes = ([pltpu.VMEM((NUM_BASES, tile_rows, LANES), jnp.float32)]
                          if use_scratch else [])
        kernel = functools.partial(_folded_batch_kernel, batch=B,
                                   use_scratch=use_scratch)
        out_3d = pl.pallas_call(
            kernel,
            out_shape=jax.ShapeDtypeStruct((B, rows, LANES), coord_dtype),
            grid_spec=pltpu.PrefetchScalarGridSpec(
                num_scalar_prefetch=1,               # basis weights land in SMEM
                grid=(num_row_tiles,),
                in_specs=[
                    pl.BlockSpec((NUM_BASES, tile_rows, LANES),
                                 lambda r, w_sm: (0, r, 0)),
                    pl.BlockSpec((B, tile_rows, LANES),
                                 lambda r, w_sm: (0, r, 0)),
                ],
                out_specs=pl.BlockSpec((B, tile_rows, LANES),
                                       lambda r, w_sm: (0, r, 0)),
                scratch_shapes=scratch_shapes,
            ),
            compiler_params=pltpu.CompilerParams(
                dimension_semantics=("parallel",),
                vmem_limit_bytes=_VMEM_LIMIT_BYTES,
            ),
        )(w, packed_flow_bases, coords_3d)
    else:
        # Batched-grid fallback: batch innermost & "arbitrary" so the bases block
        # (index_map ignores b) and the f32 scratch stay resident across batch steps;
        # rows "parallel" so a v7x megacore shards rows, not batch.
        use_scratch = need_cast
        tile_rows, num_row_tiles = _choose_tile_rows(
            rows, 1, coord_bytes, bases_bytes, use_scratch,
            vmem_budget_bytes, max_tile_rows)
        scratch_shapes = ([pltpu.VMEM((NUM_BASES, tile_rows, LANES), jnp.float32)]
                          if use_scratch else [])
        kernel = functools.partial(_batched_grid_kernel, use_scratch=use_scratch)
        out_3d = pl.pallas_call(
            kernel,
            out_shape=jax.ShapeDtypeStruct((B, rows, LANES), coord_dtype),
            grid_spec=pltpu.PrefetchScalarGridSpec(
                num_scalar_prefetch=1,
                grid=(num_row_tiles, B),
                in_specs=[
                    pl.BlockSpec((NUM_BASES, tile_rows, LANES),
                                 lambda r, b, w_sm: (0, r, 0)),
                    pl.BlockSpec((1, tile_rows, LANES),
                                 lambda r, b, w_sm: (b, r, 0)),
                ],
                out_specs=pl.BlockSpec((1, tile_rows, LANES),
                                       lambda r, b, w_sm: (b, r, 0)),
                scratch_shapes=scratch_shapes,
            ),
            compiler_params=pltpu.CompilerParams(
                dimension_semantics=("parallel", "arbitrary"),
                vmem_limit_bytes=_VMEM_LIMIT_BYTES,
            ),
        )(w, packed_flow_bases, coords_3d)

    out = out_3d.reshape(B, n_row)
    if n_row != N:
        out = out[:, :N]
    return out.reshape(B, H, W, C)


# ----------------------------------------------------------------------------
# Demo / self-check
# ----------------------------------------------------------------------------
if __name__ == "__main__":
    # image_shape = (B, C, H, W) as in the PyTorch module
    B, Cimg, Himg, Wimg = 2, 4, 16, 16

    homography_weights = jnp.array([0.05, 0.2, 0.5, 0.001], dtype=jnp.float32)
    flow_bases = gen_flow_bases(Himg, Wimg, homography_weights)         # (8, H, W, 2)

    # One-time packing of the fixed bases buffer (hoisted out of the hot path).
    packed_bf16 = pack_flow_bases(flow_bases, jnp.bfloat16)
    packed_f32 = pack_flow_bases(flow_bases, jnp.float32)               # v5e-friendly option

    key = jax.random.PRNGKey(0)
    k_coords, k_weights = jax.random.split(key)
    coordinates = jax.random.normal(k_coords, (B, Himg, Wimg, 2), dtype=jnp.float32)
    # basis_weights Parameter is zero-init in the module; use small deterministic
    # non-zero values so the compute path is actually exercised.
    basis_weights = 0.1 * jax.random.normal(k_weights, (B, NUM_BASES), dtype=jnp.float32)

    # Primary path: folded batch (B <= 8), bf16 bases.
    out = homography_basis_transform(coordinates, packed_bf16, basis_weights)
    out = jax.block_until_ready(out)
    assert out.shape == (B, Himg, Wimg, 2)

    # Kernel-exact reference (same bf16 storage of the bases, f32 accumulation)
    # and full-precision module semantics.
    bases_q = flow_bases.astype(jnp.bfloat16).astype(jnp.float32)
    ref_q = coordinates + (bases_q[None] *
                           basis_weights[:, :, None, None, None]).sum(axis=1)
    ref_f32 = coordinates + (flow_bases[None] *
                             basis_weights[:, :, None, None, None]).sum(axis=1)

    assert jnp.allclose(out, ref_q, atol=1e-5, rtol=1e-5)
    assert jnp.allclose(out, ref_f32, atol=2e-3, rtol=2e-3)

    # Fallback path: (rows, batch) grid with resident bases (forced via max_fold_batch=0).
    out_b = jax.block_until_ready(
        homography_basis_transform(coordinates, packed_bf16, basis_weights,
                                   max_fold_batch=0))
    assert jnp.allclose(out_b, ref_q, atol=1e-5, rtol=1e-5)

    # Full-f32 bases path (exact module semantics, no bf16 quantization of the bases).
    out_f = jax.block_until_ready(
        homography_basis_transform(coordinates, packed_f32, basis_weights))
    assert jnp.allclose(out_f, ref_f32, atol=1e-5, rtol=1e-5)

    print("KERNEL_OK")
</pallas_src>

<mosaic_0001>
module attributes {stable_mosaic.version = 11 : i64} {
  func.func @_folded_batch_kernel(%arg0: i32, %arg1: memref<2x8xf32, #tpu.memory_space<smem>>, %arg2: memref<8x4x128xbf16, #tpu.memory_space<vmem>>, %arg3: memref<2x4x128xf32, #tpu.memory_space<vmem>>, %arg4: memref<2x4x128xf32, #tpu.memory_space<vmem>>, %arg5: memref<8x4x128xf32, #tpu.memory_space<vmem>>) attributes {dimension_semantics = [#tpu.dimension_semantics<parallel>], iteration_bounds = array<i64: 1>, scalar_prefetch = 1 : i64, scratch_operands = 1 : i64, tpu.core_type = #tpu.core_type<tc>, window_params = [{transform_indices = @transform_0, window_bounds = array<i64: 8, 4, 128>}, {transform_indices = @transform_1, window_bounds = array<i64: 2, 4, 128>}, {transform_indices = @transform_2, window_bounds = array<i64: 2, 4, 128>}]} {
    %c0 = arith.constant 0 : index
    %c0_0 = arith.constant 0 : index
    %c0_1 = arith.constant 0 : index
    %0 = vector.load %arg2[%c0, %c0_0, %c0_1] : memref<8x4x128xbf16, #tpu.memory_space<vmem>>, vector<1x4x128xbf16>
    %1 = vector.shape_cast %0 : vector<1x4x128xbf16> to vector<4x128xbf16>
    %2 = arith.extf %1 : vector<4x128xbf16> to vector<4x128xf32>
    %c0_2 = arith.constant 0 : index
    %c0_3 = arith.constant 0 : index
    %c0_4 = arith.constant 0 : index
    %3 = vector.load %arg5[%c0_2, %c0_3, %c0_4] : memref<8x4x128xf32, #tpu.memory_space<vmem>>, vector<1x4x128xf32>
    %4 = vector.shape_cast %3 : vector<1x4x128xf32> to vector<4x128xf32>
    %5 = vector.shape_cast %2 : vector<4x128xf32> to vector<1x4x128xf32>
    tpu.vector_store %arg5[%c0_2, %c0_3, %c0_4], %5 {strides = array<i32>} : memref<8x4x128xf32, #tpu.memory_space<vmem>>, vector<1x4x128xf32>,
    %c1 = arith.constant 1 : index
    %c0_5 = arith.constant 0 : index
    %c0_6 = arith.constant 0 : index
    %6 = vector.load %arg2[%c1, %c0_5, %c0_6] : memref<8x4x128xbf16, #tpu.memory_space<vmem>>, vector<1x4x128xbf16>
    %7 = vector.shape_cast %6 : vector<1x4x128xbf16> to vector<4x128xbf16>
    %8 = arith.extf %7 : vector<4x128xbf16> to vector<4x128xf32>
    %c1_7 = arith.constant 1 : index
    %c0_8 = arith.constant 0 : index
    %c0_9 = arith.constant 0 : index
    %9 = vector.load %arg5[%c1_7, %c0_8, %c0_9] : memref<8x4x128xf32, #tpu.memory_space<vmem>>, vector<1x4x128xf32>
    %10 = vector.shape_cast %9 : vector<1x4x128xf32> to vector<4x128xf32>
    %11 = vector.shape_cast %8 : vector<4x128xf32> to vector<1x4x128xf32>
    tpu.vector_store %arg5[%c1_7, %c0_8, %c0_9], %11 {strides = array<i32>} : memref<8x4x128xf32, #tpu.memory_space<vmem>>, vector<1x4x128xf32>,
    %c2 = arith.constant 2 : index
    %c0_10 = arith.constant 0 : index
    %c0_11 = arith.constant 0 : index
    %12 = vector.load %arg2[%c2, %c0_10, %c0_11] : memref<8x4x128xbf16, #tpu.memory_space<vmem>>, vector<1x4x128xbf16>
    %13 = vector.shape_cast %12 : vector<1x4x128xbf16> to vector<4x128xbf16>
    %14 = arith.extf %13 : vector<4x128xbf16> to vector<4x128xf32>
    %c2_12 = arith.constant 2 : index
    %c0_13 = arith.constant 0 : index
    %c0_14 = arith.constant 0 : index
    %15 = vector.load %arg5[%c2_12, %c0_13, %c0_14] : memref<8x4x128xf32, #tpu.memory_space<vmem>>, vector<1x4x128xf32>
    %16 = vector.shape_cast %15 : vector<1x4x128xf32> to vector<4x128xf32>
    %17 = vector.shape_cast %14 : vector<4x128xf32> to vector<1x4x128xf32>
    tpu.vector_store %arg5[%c2_12, %c0_13, %c0_14], %17 {strides = array<i32>} : memref<8x4x128xf32, #tpu.memory_space<vmem>>, vector<1x4x128xf32>,
    %c3 = arith.constant 3 : index
    %c0_15 = arith.constant 0 : index
    %c0_16 = arith.constant 0 : index
    %18 = vector.load %arg2[%c3, %c0_15, %c0_16] : memref<8x4x128xbf16, #tpu.memory_space<vmem>>, vector<1x4x128xbf16>
    %19 = vector.shape_cast %18 : vector<1x4x128xbf16> to vector<4x128xbf16>
    %20 = arith.extf %19 : vector<4x128xbf16> to vector<4x128xf32>
    %c3_17 = arith.constant 3 : index
    %c0_18 = arith.constant 0 : index
    %c0_19 = arith.constant 0 : index
    %21 = vector.load %arg5[%c3_17, %c0_18, %c0_19] : memref<8x4x128xf32, #tpu.memory_space<vmem>>, vector<1x4x128xf32>
    %22 = vector.shape_cast %21 : vector<1x4x128xf32> to vector<4x128xf32>
    %23 = vector.shape_cast %20 : vector<4x128xf32> to vector<1x4x128xf32>
    tpu.vector_store %arg5[%c3_17, %c0_18, %c0_19], %23 {strides = array<i32>} : memref<8x4x128xf32, #tpu.memory_space<vmem>>, vector<1x4x128xf32>,
    %c4 = arith.constant 4 : index
    %c0_20 = arith.constant 0 : index
    %c0_21 = arith.constant 0 : index
    %24 = vector.load %arg2[%c4, %c0_20, %c0_21] : memref<8x4x128xbf16, #tpu.memory_space<vmem>>, vector<1x4x128xbf16>
    %25 = vector.shape_cast %24 : vector<1x4x128xbf16> to vector<4x128xbf16>
    %26 = arith.extf %25 : vector<4x128xbf16> to vector<4x128xf32>
    %c4_22 = arith.constant 4 : index
    %c0_23 = arith.constant 0 : index
    %c0_24 = arith.constant 0 : index
    %27 = vector.load %arg5[%c4_22, %c0_23, %c0_24] : memref<8x4x128xf32, #tpu.memory_space<vmem>>, vector<1x4x128xf32>
    %28 = vector.shape_cast %27 : vector<1x4x128xf32> to vector<4x128xf32>
    %29 = vector.shape_cast %26 : vector<4x128xf32> to vector<1x4x128xf32>
    tpu.vector_store %arg5[%c4_22, %c0_23, %c0_24], %29 {strides = array<i32>} : memref<8x4x128xf32, #tpu.memory_space<vmem>>, vector<1x4x128xf32>,
    %c5 = arith.constant 5 : index
    %c0_25 = arith.constant 0 : index
    %c0_26 = arith.constant 0 : index
    %30 = vector.load %arg2[%c5, %c0_25, %c0_26] : memref<8x4x128xbf16, #tpu.memory_space<vmem>>, vector<1x4x128xbf16>
    %31 = vector.shape_cast %30 : vector<1x4x128xbf16> to vector<4x128xbf16>
    %32 = arith.extf %31 : vector<4x128xbf16> to vector<4x128xf32>
    %c5_27 = arith.constant 5 : index
    %c0_28 = arith.constant 0 : index
    %c0_29 = arith.constant 0 : index
    %33 = vector.load %arg5[%c5_27, %c0_28, %c0_29] : memref<8x4x128xf32, #tpu.memory_space<vmem>>, vector<1x4x128xf32>
    %34 = vector.shape_cast %33 : vector<1x4x128xf32> to vector<4x128xf32>
    %35 = vector.shape_cast %32 : vector<4x128xf32> to vector<1x4x128xf32>
    tpu.vector_store %arg5[%c5_27, %c0_28, %c0_29], %35 {strides = array<i32>} : memref<8x4x128xf32, #tpu.memory_space<vmem>>, vector<1x4x128xf32>,
    %c6 = arith.constant 6 : index
    %c0_30 = arith.constant 0 : index
    %c0_31 = arith.constant 0 : index
    %36 = vector.load %arg2[%c6, %c0_30, %c0_31] : memref<8x4x128xbf16, #tpu.memory_space<vmem>>, vector<1x4x128xbf16>
    %37 = vector.shape_cast %36 : vector<1x4x128xbf16> to vector<4x128xbf16>
    %38 = arith.extf %37 : vector<4x128xbf16> to vector<4x128xf32>
    %c6_32 = arith.constant 6 : index
    %c0_33 = arith.constant 0 : index
    %c0_34 = arith.constant 0 : index
    %39 = vector.load %arg5[%c6_32, %c0_33, %c0_34] : memref<8x4x128xf32, #tpu.memory_space<vmem>>, vector<1x4x128xf32>
    %40 = vector.shape_cast %39 : vector<1x4x128xf32> to vector<4x128xf32>
    %41 = vector.shape_cast %38 : vector<4x128xf32> to vector<1x4x128xf32>
    tpu.vector_store %arg5[%c6_32, %c0_33, %c0_34], %41 {strides = array<i32>} : memref<8x4x128xf32, #tpu.memory_space<vmem>>, vector<1x4x128xf32>,
    %c7 = arith.constant 7 : index
    %c0_35 = arith.constant 0 : index
    %c0_36 = arith.constant 0 : index
    %42 = vector.load %arg2[%c7, %c0_35, %c0_36] : memref<8x4x128xbf16, #tpu.memory_space<vmem>>, vector<1x4x128xbf16>
    %43 = vector.shape_cast %42 : vector<1x4x128xbf16> to vector<4x128xbf16>
    %44 = arith.extf %43 : vector<4x128xbf16> to vector<4x128xf32>
    %c7_37 = arith.constant 7 : index
    %c0_38 = arith.constant 0 : index
    %c0_39 = arith.constant 0 : index
    %45 = vector.load %arg5[%c7_37, %c0_38, %c0_39] : memref<8x4x128xf32, #tpu.memory_space<vmem>>, vector<1x4x128xf32>
    %46 = vector.shape_cast %45 : vector<1x4x128xf32> to vector<4x128xf32>
    %47 = vector.shape_cast %44 : vector<4x128xf32> to vector<1x4x128xf32>
    tpu.vector_store %arg5[%c7_37, %c0_38, %c0_39], %47 {strides = array<i32>} : memref<8x4x128xf32, #tpu.memory_space<vmem>>, vector<1x4x128xf32>,
    %c0_40 = arith.constant 0 : index
    %c0_41 = arith.constant 0 : index
    %c0_42 = arith.constant 0 : index
    %48 = vector.load %arg3[%c0_40, %c0_41, %c0_42] : memref<2x4x128xf32, #tpu.memory_space<vmem>>, vector<1x4x128xf32>
    %49 = vector.shape_cast %48 : vector<1x4x128xf32> to vector<4x128xf32>
    %c0_43 = arith.constant 0 : index
    %c0_44 = arith.constant 0 : index
    %50 = memref.load %arg1[%c0_43, %c0_44] : memref<2x8xf32, #tpu.memory_space<smem>>
    %c0_45 = arith.constant 0 : index
    %c0_46 = arith.constant 0 : index
    %c0_47 = arith.constant 0 : index
    %51 = vector.load %arg5[%c0_45, %c0_46, %c0_47] : memref<8x4x128xf32, #tpu.memory_space<vmem>>, vector<1x4x128xf32>
    %52 = vector.shape_cast %51 : vector<1x4x128xf32> to vector<4x128xf32>
    %53 = vector.broadcast %50 : f32 to vector<4x128xf32>
    %54 = arith.mulf %53, %52 : vector<4x128xf32>
    %55 = arith.addf %49, %54 : vector<4x128xf32>
    %c0_48 = arith.constant 0 : index
    %c1_49 = arith.constant 1 : index
    %56 = memref.load %arg1[%c0_48, %c1_49] : memref<2x8xf32, #tpu.memory_space<smem>>
    %c1_50 = arith.constant 1 : index
    %c0_51 = arith.constant 0 : index
    %c0_52 = arith.constant 0 : index
    %57 = vector.load %arg5[%c1_50, %c0_51, %c0_52] : memref<8x4x128xf32, #tpu.memory_space<vmem>>, vector<1x4x128xf32>
    %58 = vector.shape_cast %57 : vector<1x4x128xf32> to vector<4x128xf32>
    %59 = vector.broadcast %56 : f32 to vector<4x128xf32>
    %60 = arith.mulf %59, %58 : vector<4x128xf32>
    %61 = arith.addf %55, %60 : vector<4x128xf32>
    %c0_53 = arith.constant 0 : index
    %c2_54 = arith.constant 2 : index
    %62 = memref.load %arg1[%c0_53, %c2_54] : memref<2x8xf32, #tpu.memory_space<smem>>
    %c2_55 = arith.constant 2 : index
    %c0_56 = arith.constant 0 : index
    %c0_57 = arith.constant 0 : index
    %63 = vector.load %arg5[%c2_55, %c0_56, %c0_57] : memref<8x4x128xf32, #tpu.memory_space<vmem>>, vector<1x4x128xf32>
    %64 = vector.shape_cast %63 : vector<1x4x128xf32> to vector<4x128xf32>
    %65 = vector.broadcast %62 : f32 to vector<4x128xf32>
    %66 = arith.mulf %65, %64 : vector<4x128xf32>
    %67 = arith.addf %61, %66 : vector<4x128xf32>
    %c0_58 = arith.constant 0 : index
    %c3_59 = arith.constant 3 : index
    %68 = memref.load %arg1[%c0_58, %c3_59] : memref<2x8xf32, #tpu.memory_space<smem>>
    %c3_60 = arith.constant 3 : index
    %c0_61 = arith.constant 0 : index
    %c0_62 = arith.constant 0 : index
    %69 = vector.load %arg5[%c3_60, %c0_61, %c0_62] : memref<8x4x128xf32, #tpu.memory_space<vmem>>, vector<1x4x128xf32>
    %70 = vector.shape_cast %69 : vector<1x4x128xf32> to vector<4x128xf32>
    %71 = vector.broadcast %68 : f32 to vector<4x128xf32>
    %72 = arith.mulf %71, %70 : vector<4x128xf32>
    %73 = arith.addf %67, %72 : vector<4x128xf32>
    %c0_63 = arith.constant 0 : index
    %c4_64 = arith.constant 4 : index
    %74 = memref.load %arg1[%c0_63, %c4_64] : memref<2x8xf32, #tpu.memory_space<smem>>
    %c4_65 = arith.constant 4 : index
    %c0_66 = arith.constant 0 : index
    %c0_67 = arith.constant 0 : index
    %75 = vector.load %arg5[%c4_65, %c0_66, %c0_67] : memref<8x4x128xf32, #tpu.memory_space<vmem>>, vector<1x4x128xf32>
    %76 = vector.shape_cast %75 : vector<1x4x128xf32> to vector<4x128xf32>
    %77 = vector.broadcast %74 : f32 to vector<4x128xf32>
    %78 = arith.mulf %77, %76 : vector<4x128xf32>
    %79 = arith.addf %73, %78 : vector<4x128xf32>
    %c0_68 = arith.constant 0 : index
    %c5_69 = arith.constant 5 : index
    %80 = memref.load %arg1[%c0_68, %c5_69] : memref<2x8xf32, #tpu.memory_space<smem>>
    %c5_70 = arith.constant 5 : index
    %c0_71 = arith.constant 0 : index
    %c0_72 = arith.constant 0 : index
    %81 = vector.load %arg5[%c5_70, %c0_71, %c0_72] : memref<8x4x128xf32, #tpu.memory_space<vmem>>, vector<1x4x128xf32>
    %82 = vector.shape_cast %81 : vector<1x4x128xf32> to vector<4x128xf32>
    %83 = vector.broadcast %80 : f32 to vector<4x128xf32>
    %84 = arith.mulf %83, %82 : vector<4x128xf32>
    %85 = arith.addf %79, %84 : vector<4x128xf32>
    %c0_73 = arith.constant 0 : index
    %c6_74 = arith.constant 6 : index
    %86 = memref.load %arg1[%c0_73, %c6_74] : memref<2x8xf32, #tpu.memory_space<smem>>
    %c6_75 = arith.constant 6 : index
    %c0_76 = arith.constant 0 : index
    %c0_77 = arith.constant 0 : index
    %87 = vector.load %arg5[%c6_75, %c0_76, %c0_77] : memref<8x4x128xf32, #tpu.memory_space<vmem>>, vector<1x4x128xf32>
    %88 = vector.shape_cast %87 : vector<1x4x128xf32> to vector<4x128xf32>
    %89 = vector.broadcast %86 : f32 to vector<4x128xf32>
    %90 = arith.mulf %89, %88 : vector<4x128xf32>
    %91 = arith.addf %85, %90 : vector<4x128xf32>
    %c0_78 = arith.constant 0 : index
    %c7_79 = arith.constant 7 : index
    %92 = memref.load %arg1[%c0_78, %c7_79] : memref<2x8xf32, #tpu.memory_space<smem>>
    %c7_80 = arith.constant 7 : index
    %c0_81 = arith.constant 0 : index
    %c0_82 = arith.constant 0 : index
    %93 = vector.load %arg5[%c7_80, %c0_81, %c0_82] : memref<8x4x128xf32, #tpu.memory_space<vmem>>, vector<1x4x128xf32>
    %94 = vector.shape_cast %93 : vector<1x4x128xf32> to vector<4x128xf32>
    %95 = vector.broadcast %92 : f32 to vector<4x128xf32>
    %96 = arith.mulf %95, %94 : vector<4x128xf32>
    %97 = arith.addf %91, %96 : vector<4x128xf32>
    %c0_83 = arith.constant 0 : index
    %c0_84 = arith.constant 0 : index
    %c0_85 = arith.constant 0 : index
    %98 = vector.load %arg4[%c0_83, %c0_84, %c0_85] : memref<2x4x128xf32, #tpu.memory_space<vmem>>, vector<1x4x128xf32>
    %99 = vector.shape_cast %98 : vector<1x4x128xf32> to vector<4x128xf32>
    %100 = vector.shape_cast %97 : vector<4x128xf32> to vector<1x4x128xf32>
    tpu.vector_store %arg4[%c0_83, %c0_84, %c0_85], %100 {strides = array<i32>} : memref<2x4x128xf32, #tpu.memory_space<vmem>>, vector<1x4x128xf32>,
    %c1_86 = arith.constant 1 : index
    %c0_87 = arith.constant 0 : index
    %c0_88 = arith.constant 0 : index
    %101 = vector.load %arg3[%c1_86, %c0_87, %c0_88] : memref<2x4x128xf32, #tpu.memory_space<vmem>>, vector<1x4x128xf32>
    %102 = vector.shape_cast %101 : vector<1x4x128xf32> to vector<4x128xf32>
    %c1_89 = arith.constant 1 : index
    %c0_90 = arith.constant 0 : index
    %103 = memref.load %arg1[%c1_89, %c0_90] : memref<2x8xf32, #tpu.memory_space<smem>>
    %c0_91 = arith.constant 0 : index
    %c0_92 = arith.constant 0 : index
    %c0_93 = arith.constant 0 : index
    %104 = vector.load %arg5[%c0_91, %c0_92, %c0_93] : memref<8x4x128xf32, #tpu.memory_space<vmem>>, vector<1x4x128xf32>
    %105 = vector.shape_cast %104 : vector<1x4x128xf32> to vector<4x128xf32>
    %106 = vector.broadcast %103 : f32 to vector<4x128xf32>
    %107 = arith.mulf %106, %105 : vector<4x128xf32>
    %108 = arith.addf %102, %107 : vector<4x128xf32>
    %c1_94 = arith.constant 1 : index
    %c1_95 = arith.constant 1 : index
    %109 = memref.load %arg1[%c1_94, %c1_95] : memref<2x8xf32, #tpu.memory_space<smem>>
    %c1_96 = arith.constant 1 : index
    %c0_97 = arith.constant 0 : index
    %c0_98 = arith.constant 0 : index
    %110 = vector.load %arg5[%c1_96, %c0_97, %c0_98] : memref<8x4x128xf32, #tpu.memory_space<vmem>>, vector<1x4x128xf32>
    %111 = vector.shape_cast %110 : vector<1x4x128xf32> to vector<4x128xf32>
    %112 = vector.broadcast %109 : f32 to vector<4x128xf32>
    %113 = arith.mulf %112, %111 : vector<4x128xf32>
    %114 = arith.addf %108, %113 : vector<4x128xf32>
    %c1_99 = arith.constant 1 : index
    %c2_100 = arith.constant 2 : index
    %115 = memref.load %arg1[%c1_99, %c2_100] : memref<2x8xf32, #tpu.memory_space<smem>>
    %c2_101 = arith.constant 2 : index
    %c0_102 = arith.constant 0 : index
    %c0_103 = arith.constant 0 : index
    %116 = vector.load %arg5[%c2_101, %c0_102, %c0_103] : memref<8x4x128xf32, #tpu.memory_space<vmem>>, vector<1x4x128xf32>
    %117 = vector.shape_cast %116 : vector<1x4x128xf32> to vector<4x128xf32>
    %118 = vector.broadcast %115 : f32 to vector<4x128xf32>
    %119 = arith.mulf %118, %117 : vector<4x128xf32>
    %120 = arith.addf %114, %119 : vector<4x128xf32>
    %c1_104 = arith.constant 1 : index
    %c3_105 = arith.constant 3 : index
    %121 = memref.load %arg1[%c1_104, %c3_105] : memref<2x8xf32, #tpu.memory_space<smem>>
    %c3_106 = arith.constant 3 : index
    %c0_107 = arith.constant 0 : index
    %c0_108 = arith.constant 0 : index
    %122 = vector.load %arg5[%c3_106, %c0_107, %c0_108] : memref<8x4x128xf32, #tpu.memory_space<vmem>>, vector<1x4x128xf32>
    %123 = vector.shape_cast %122 : vector<1x4x128xf32> to vector<4x128xf32>
    %124 = vector.broadcast %121 : f32 to vector<4x128xf32>
    %125 = arith.mulf %124, %123 : vector<4x128xf32>
    %126 = arith.addf %120, %125 : vector<4x128xf32>
    %c1_109 = arith.constant 1 : index
    %c4_110 = arith.constant 4 : index
    %127 = memref.load %arg1[%c1_109, %c4_110] : memref<2x8xf32, #tpu.memory_space<smem>>
    %c4_111 = arith.constant 4 : index
    %c0_112 = arith.constant 0 : index
    %c0_113 = arith.constant 0 : index
    %128 = vector.load %arg5[%c4_111, %c0_112, %c0_113] : memref<8x4x128xf32, #tpu.memory_space<vmem>>, vector<1x4x128xf32>
    %129 = vector.shape_cast %128 : vector<1x4x128xf32> to vector<4x128xf32>
    %130 = vector.broadcast %127 : f32 to vector<4x128xf32>
    %131 = arith.mulf %130, %129 : vector<4x128xf32>
    %132 = arith.addf %126, %131 : vector<4x128xf32>
    %c1_114 = arith.constant 1 : index
    %c5_115 = arith.constant 5 : index
    %133 = memref.load %arg1[%c1_114, %c5_115] : memref<2x8xf32, #tpu.memory_space<smem>>
    %c5_116 = arith.constant 5 : index
    %c0_117 = arith.constant 0 : index
    %c0_118 = arith.constant 0 : index
    %134 = vector.load %arg5[%c5_116, %c0_117, %c0_118] : memref<8x4x128xf32, #tpu.memory_space<vmem>>, vector<1x4x128xf32>
    %135 = vector.shape_cast %134 : vector<1x4x128xf32> to vector<4x128xf32>
    %136 = vector.broadcast %133 : f32 to vector<4x128xf32>
    %137 = arith.mulf %136, %135 : vector<4x128xf32>
    %138 = arith.addf %132, %137 : vector<4x128xf32>
    %c1_119 = arith.constant 1 : index
    %c6_120 = arith.constant 6 : index
    %139 = memref.load %arg1[%c1_119, %c6_120] : memref<2x8xf32, #tpu.memory_space<smem>>
    %c6_121 = arith.constant 6 : index
    %c0_122 = arith.constant 0 : index
    %c0_123 = arith.constant 0 : index
    %140 = vector.load %arg5[%c6_121, %c0_122, %c0_123] : memref<8x4x128xf32, #tpu.memory_space<vmem>>, vector<1x4x128xf32>
    %141 = vector.shape_cast %140 : vector<1x4x128xf32> to vector<4x128xf32>
    %142 = vector.broadcast %139 : f32 to vector<4x128xf32>
    %143 = arith.mulf %142, %141 : vector<4x128xf32>
    %144 = arith.addf %138, %143 : vector<4x128xf32>
    %c1_124 = arith.constant 1 : index
    %c7_125 = arith.constant 7 : index
    %145 = memref.load %arg1[%c1_124, %c7_125] : memref<2x8xf32, #tpu.memory_space<smem>>
    %c7_126 = arith.constant 7 : index
    %c0_127 = arith.constant 0 : index
    %c0_128 = arith.constant 0 : index
    %146 = vector.load %arg5[%c7_126, %c0_127, %c0_128] : memref<8x4x128xf32, #tpu.memory_space<vmem>>, vector<1x4x128xf32>
    %147 = vector.shape_cast %146 : vector<1x4x128xf32> to vector<4x128xf32>
    %148 = vector.broadcast %145 : f32 to vector<4x128xf32>
    %149 = arith.mulf %148, %147 : vector<4x128xf32>
    %150 = arith.addf %144, %149 : vector<4x128xf32>
    %c1_129 = arith.constant 1 : index
    %c0_130 = arith.constant 0 : index
    %c0_131 = arith.constant 0 : index
    %151 = vector.load %arg4[%c1_129, %c0_130, %c0_131] : memref<2x4x128xf32, #tpu.memory_space<vmem>>, vector<1x4x128xf32>
    %152 = vector.shape_cast %151 : vector<1x4x128xf32> to vector<4x128xf32>
    %153 = vector.shape_cast %150 : vector<4x128xf32> to vector<1x4x128xf32>
    tpu.vector_store %arg4[%c1_129, %c0_130, %c0_131], %153 {strides = array<i32>} : memref<2x4x128xf32, #tpu.memory_space<vmem>>, vector<1x4x128xf32>,
    return
  }
  func.func @transform_0(%arg0: i32, %arg1: memref<2x8xf32, #tpu.memory_space<smem>>) -> (i32, i32, i32) {
    %c0_i32 = arith.constant 0 : i32
    %c0_i32_0 = arith.constant 0 : i32
    %c0_i32_1 = arith.constant 0 : i32
    return %c0_i32, %arg0, %c0_i32_0 : i32, i32, i32
  }
  func.func @transform_1(%arg0: i32, %arg1: memref<2x8xf32, #tpu.memory_space<smem>>) -> (i32, i32, i32) {
    %c0_i32 = arith.constant 0 : i32
    %c0_i32_0 = arith.constant 0 : i32
    %c0_i32_1 = arith.constant 0 : i32
    return %c0_i32, %arg0, %c0_i32_0 : i32, i32, i32
  }
  func.func @transform_2(%arg0: i32, %arg1: memref<2x8xf32, #tpu.memory_space<smem>>) -> (i32, i32, i32) {
    %c0_i32 = arith.constant 0 : i32
    %c0_i32_0 = arith.constant 0 : i32
    %c0_i32_1 = arith.constant 0 : i32
    return %c0_i32, %arg0, %c0_i32_0 : i32, i32, i32
  }
}

</mosaic_0001>

<bundles_post_ra>
// kernel: homography_basis_transform.1
= control target key start
LH: loop header
LB: loop body
LE: loop exit
PB: predicated region body
PF: predicated region fallthrough
CT: control target
= control target key end

     0   :  { %s311_s0 = inlined_call_operand.vmem [shape: f32[2,8], index: 0, kind: input, shape index: {}]   ;;  %s312_s1 = inlined_call_operand.vmem [shape: bf16[8,4,128], index: 1, kind: input, shape index: {}]   ;;  %s313_s2 = inlined_call_operand.vmem [shape: f32[2,4,128], index: 2, kind: input, shape index: {}]   ;;  %s314_s3 = inlined_call_operand.vmem [shape: f32[2,4,128], index: 3, kind: output, shape index: {}]  }
   0x1   :  { %s8_s14 = sshll.u32 %s311_s0, 4  ;;  %s9_s14 = int_to_ptr.vmem [resolvable:$true] %s8_s14 }
   0x2   :  { %s195_s15 = scalar_lea.vmem %s9_s14, 32  ;;  %p200_p1 = scmp.lt.s32.totalorder %s9_s14, %s9_s14 }
   0x3   :  { %p196_p0 = scmp.ne.s32.totalorder %s9_s14, %s195_s15  ;;  %p201_p2 = scmp.lt.s32.totalorder %s195_s15, %s195_s15 }
   0x5   :  { %p202_p3 = por %p201_p2, %p200_p1 }
   0x7   :  { %p203_p4 = pnand %p202_p3, %p196_p0 }
   0x9   :  { %206 = shalt.err (!%p203_p4)  }
   0xa   :  { %s209_s16 = smov [#allocation4]  }
   0xb   :  { %11 = dma.vmem_to_smem %s9_s14, 32, %s209_s16, [#allocation3] }
   0xc   :  { %207 = dma.done.wait [#allocation3], 32 }
   0xd   :  { %208 = vsyncadd [#allocation3], 4294967264 }
   0xe   :  { %13 = sfence }
   0xf   :  { %v18_v0 = vld [vmem:[%s312_s1] sm:$0x3]  ;;  %v146_v1 = vld [vmem:[%s312_s1 + $0x2] sm:$0x3]  ;;  %v147_v2 = vld [vmem:[%s312_s1 + $0x4] sm:$0x3] }
  0x10   :  { %v19_v3 = vunpack.c.l.bf16 %v18_v0  ;;  %v23_v4 = vunpack.c.l.bf16 %v146_v1  ;;  %v28_v5 = vunpack.c.l.bf16 %v147_v2  ;;  %v148_v6 = vld [vmem:[%s312_s1 + $0x6] sm:$0x3]  ;;  %v149_v7 = vld [vmem:[%s312_s1 + $0x8] sm:$0x3]  ;;  %v150_v8 = vld [vmem:[%s312_s1 + $0xa] sm:$0x3] }
  0x11   :  { %v33_v9 = vunpack.c.l.bf16 %v148_v6  ;;  %v38_v10 = vunpack.c.l.bf16 %v149_v7  ;;  %v43_v11 = vunpack.c.l.bf16 %v150_v8  ;;  %v151_v12 = vld [vmem:[%s312_s1 + $0xc] sm:$0x3]  ;;  %v152_v13 = vld [vmem:[%s312_s1 + $0xe] sm:$0x3]  ;;  %s57_s5 = sld [smem:[#allocation4]]  ;;  %s257_s6 = sld [smem:[#allocation4 + $0x1]] }
  0x12   :  { %v190_v14 = vcombine.low %v19_v3, %v23_v4  ;;  %v48_v15 = vunpack.c.l.bf16 %v151_v12  ;;  %v53_v16 = vunpack.c.l.bf16 %v152_v13  ;;  %s259_s7 = sld [smem:[#allocation4 + $0x2]]  ;;  %s261_s8 = sld [smem:[#allocation4 + $0x3]]  ;;  %v56_v20 = vld [vmem:[%s313_s2] sm:$0xf]  ;;  %v160_v22 = vld [vmem:[%s313_s2 + $0x4] sm:$0xf] }
  0x13   :  { %v191_v17 = vcombine.low %v28_v5, %v33_v9  ;;  %v192_v18 = vcombine.low %v38_v10, %v43_v11  ;;  %s161_s1 = sld [smem:[#allocation4 + $0x80]]  ;;  %s263_s9 = sld [smem:[#allocation4 + $0x81]] }
  0x14   :  { %174 = vst [vmem:[#allocation2] sm:$0xff] %v190_v14   ;;  %v193_v19 = vcombine.low %v48_v15, %v53_v16  ;;  %s265_s10 = sld [smem:[#allocation4 + $0x4]]  ;;  %s267_s11 = sld [smem:[#allocation4 + $0x82]] }
  0x15   :  { %179 = vst [vmem:[#allocation2 + $0x8] sm:$0xff] %v191_v17   ;;  %184 = vst [vmem:[#allocation2 + $0x10] sm:$0xff] %v192_v18   ;;  %s269_s12 = sld [smem:[#allocation4 + $0x83]]  ;;  %s271_s13 = sld [smem:[#allocation4 + $0x84]] }
  0x16   :  { %189 = vst [vmem:[#allocation2 + $0x18] sm:$0xff] %v193_v19   ;;  %s276_s16 = sld [smem:[#allocation4 + $0x5]]  ;;  %s278_s17 = sld [smem:[#allocation4 + $0x6]] }
  0x17   :  { %v59_v21 = vstv %s57_s5  ;;  %v64_v25 = vstv %s257_s6  ;;  %s286_s20 = sld [smem:[#allocation4 + $0x85]]  ;;  %s288_s0 = sld [smem:[#allocation4 + $0x86]] }
  0x18   :  { %v69_v26 = vstv %s259_s7  ;;  %v74_v36 = vstv %s261_s8  ;;  %s292_s2 = sld [smem:[#allocation4 + $0x7]] }
  0x19   :  { %v102_v30 = vstv %s161_s1  ;;  %v107_v31 = vstv %s263_s9  ;;  %s297_s21 = sld [smem:[#allocation4 + $0x87]] }
  0x1a   :  { %v79_v41 = vstv %s265_s10  ;;  %v112_v44 = vstv %s267_s11 }
  0x1b   :  { %v58_v23 = vld [vmem:[#allocation2] sm:$0xf]  ;;  %v63_v24 = vld [vmem:[#allocation2 + $0x4] sm:$0xf]  ;;  %v117_v48 = vstv %s269_s12  ;;  %v122_v50 = vstv %s271_s13 }
  0x1c   :  { %v101_v27 = vld [vmem:[#allocation2] sm:$0xf]  ;;  %v60_v28 = vmul.f32 %v59_v21, %v58_v23  ;;  %v68_v29 = vld [vmem:[#allocation2 + $0x8] sm:$0xf]  ;;  %v65_v34 = vmul.f32 %v64_v25, %v63_v24  ;;  %v106_v37 = vld [vmem:[#allocation2 + $0x4] sm:$0xf]  ;;  %v84_v55 = vstv %s276_s16  ;;  %v89_v58 = vstv %s278_s17 }
  0x1d   :  { %v103_v32 = vmul.f32 %v102_v30, %v101_v27  ;;  %v70_v35 = vmul.f32 %v69_v26, %v68_v29  ;;  %v111_v38 = vld [vmem:[#allocation2 + $0x8] sm:$0xf]  ;;  %v73_v39 = vld [vmem:[#allocation2 + $0xc] sm:$0xf]  ;;  %v78_v40 = vld [vmem:[#allocation2 + $0x10] sm:$0xf]  ;;  %v108_v43 = vmul.f32 %v107_v31, %v106_v37  ;;  %v127_v0 = vstv %s286_s20 }
  0x1e   :  { %v61_v33 = vadd.f32 %v60_v28, %v56_v20  ;;  %v113_v46 = vmul.f32 %v112_v44, %v111_v38  ;;  %v116_v47 = vld [vmem:[#allocation2 + $0xc] sm:$0xf]  ;;  %v121_v49 = vld [vmem:[#allocation2 + $0x10] sm:$0xf]  ;;  %v75_v53 = vmul.f32 %v74_v36, %v73_v39  ;;  %v80_v54 = vmul.f32 %v79_v41, %v78_v40  ;;  %v83_v56 = vld [vmem:[#allocation2 + $0x14] sm:$0xf] }
  0x1f   :  { %v104_v42 = vadd.f32 %v160_v22, %v103_v32  ;;  %v88_v57 = vld [vmem:[#allocation2 + $0x18] sm:$0xf]  ;;  %v118_v60 = vmul.f32 %v117_v48, %v116_v47  ;;  %v123_v61 = vmul.f32 %v122_v50, %v121_v49  ;;  %v126_v63 = vld [vmem:[#allocation2 + $0x14] sm:$0xf]  ;;  %v132_v2 = vstv %s288_s0  ;;  %v93_v7 = vld [vmem:[#allocation2 + $0x1c] sm:$0xf] }
  0x20   :  { %v66_v45 = vadd.f32 %v65_v34, %v61_v33  ;;  %v131_v1 = vld [vmem:[#allocation2 + $0x18] sm:$0xf]  ;;  %v85_v5 = vmul.f32 %v84_v55, %v83_v56  ;;  %v90_v6 = vmul.f32 %v89_v58, %v88_v57  ;;  %v94_v8 = vstv %s292_s2  ;;  %v136_v13 = vld [vmem:[#allocation2 + $0x1c] sm:$0xf] }
  0x21   :  { %v109_v51 = vadd.f32 %v108_v43, %v104_v42  ;;  %v128_v10 = vmul.f32 %v127_v0, %v126_v63  ;;  %v133_v11 = vmul.f32 %v132_v2, %v131_v1  ;;  %v137_v14 = vstv %s297_s21 }
  0x22   :  { %v71_v52 = vadd.f32 %v70_v35, %v66_v45  ;;  %v95_v17 = vmul.f32 %v94_v8, %v93_v7  ;;  %v138_v19 = vmul.f32 %v137_v14, %v136_v13 }
  0x23   :  { %v114_v59 = vadd.f32 %v113_v46, %v109_v51 }
  0x24   :  { %v76_v62 = vadd.f32 %v75_v53, %v71_v52 }
  0x25   :  { %v119_v3 = vadd.f32 %v118_v60, %v114_v59 }
  0x26   :  { %v81_v4 = vadd.f32 %v80_v54, %v76_v62 }
  0x27   :  { %v124_v9 = vadd.f32 %v123_v61, %v119_v3 }
  0x28   :  { %v86_v12 = vadd.f32 %v85_v5, %v81_v4 }
  0x29   :  { %v129_v15 = vadd.f32 %v128_v10, %v124_v9 }
  0x2a   :  { %v91_v16 = vadd.f32 %v90_v6, %v86_v12 }
  0x2b   :  { %v134_v18 = vadd.f32 %v133_v11, %v129_v15 }
  0x2c   :  { %v96_v20 = vadd.f32 %v95_v17, %v91_v16 }
  0x2d   :  { %v139_v21 = vadd.f32 %v138_v19, %v134_v18 }
  0x2e   :  { %97 = vst [vmem:[%s314_s3] sm:$0xf] %v96_v20 }
  0x2f   :  { %169 = vst [vmem:[%s314_s3 + $0x4] sm:$0xf] %v139_v21 }

</bundles_post_ra>
